<compile_context>
chip_gen: v7x
topology: tpu7x:2x2x1
jax: 0.10.0
libtpu: 0.0.40
codegen_flags: <defaults>
</compile_context>

<pallas_src>
import functools

import jax
import jax.numpy as jnp
from jax import lax
from jax.experimental import pallas as pl
from jax.experimental.pallas import tpu as pltpu

LANE = 128


def _round_up(n, m):
    return ((n + m - 1) // m) * m


# ------------------------------ Pallas kernels ------------------------------ #

def _spectral_vpu_kernel(x_ref, xsum_ref, qw_ref, out_ref, *, scales, consts, unroll):
    """Lane-dense VPU contraction (small channel counts).

    x_ref   : f32 [2(ri), I, B, Mp]   input-channel axis leading (clean [B, Mp] views)
    xsum_ref: f32 [2(ri), B, Mp]      hoisted sum_i x_i (affine correction)
    qw_ref  : i8  [2(ri), I, TO, Mp]  quantized weights, O-tile (stay int8 in VMEM)
    out_ref : f32 [2(ri), B, TO, Mp]
    scales/consts: per-corner trace-time floats, const = 127*scale + min_val.
    """
    corner = pl.program_id(0)
    scale = jnp.where(corner == 0, scales[0], scales[1]).astype(jnp.float32)
    const = jnp.where(corner == 0, consts[0], consts[1]).astype(jnp.float32)

    n_in = qw_ref.shape[1]
    to = qw_ref.shape[2]
    b = x_ref.shape[2]
    mp = x_ref.shape[3]

    def body(i, carry):
        acc_r, acc_i = carry
        xr = x_ref[0, i]                        # [B, Mp]
        xi = x_ref[1, i]
        qr = qw_ref[0, i].astype(jnp.float32)   # [TO, Mp] (cast only; dequant factored out)
        qi = qw_ref[1, i].astype(jnp.float32)
        acc_r = acc_r + xr[:, None, :] * qr[None] - xi[:, None, :] * qi[None]
        acc_i = acc_i + xi[:, None, :] * qr[None] + xr[:, None, :] * qi[None]
        return acc_r, acc_i

    acc0 = (jnp.zeros((b, to, mp), jnp.float32),
            jnp.zeros((b, to, mp), jnp.float32))
    acc_r, acc_i = lax.fori_loop(0, n_in, body, acc0, unroll=unroll)

    # Rank-1 affine correction (real/imag weight components share (scale, min)
    # per corner under the module's joint quantization scheme).
    xs_r = xsum_ref[0][:, None, :]              # [B, 1, Mp]
    xs_i = xsum_ref[1][:, None, :]
    out_ref[0] = scale * acc_r + const * (xs_r - xs_i)
    out_ref[1] = scale * acc_i + const * (xs_r + xs_i)


def _spectral_mxu_kernel(x_ref, xsum_ref, qw_ref, out_ref, *, scales, consts):
    """Batched-MXU contraction over input channels (one matmul per kept mode).

    x_ref   : f32 [2(ri), TM, B, I]
    xsum_ref: f32 [2(ri), TM, B, 1]
    qw_ref  : i8  [2(ri), TM, I, O]
    out_ref : f32 [2(ri), TM, B, O]
    """
    corner = pl.program_id(0)
    scale = jnp.where(corner == 0, scales[0], scales[1]).astype(jnp.float32)
    const = jnp.where(corner == 0, consts[0], consts[1]).astype(jnp.float32)

    xr = x_ref[0]                               # [TM, B, I]
    xi = x_ref[1]
    # TODO(synk): on v5e/v6e keep int8 weights native into an int8 MXU dot (with
    #             quantized activations); on v7x stage a bf16 cast in VMEM scratch.
    #             A single per-block f32 cast keeps the demo exact vs the f32 ref.
    qr = qw_ref[0].astype(jnp.float32)          # [TM, I, O]
    qi = qw_ref[1].astype(jnp.float32)

    # 3-real-matmul (Karatsuba) complex trick: precompute (qr+qi), (xr+xi) once.
    p1 = jnp.einsum("mbi,mio->mbo", xr, qr, preferred_element_type=jnp.float32)
    p2 = jnp.einsum("mbi,mio->mbo", xi, qi, preferred_element_type=jnp.float32)
    p3 = jnp.einsum("mbi,mio->mbo", xr + xi, qr + qi,
                    preferred_element_type=jnp.float32)

    cr = xsum_ref[0]                            # [TM, B, 1]
    ci = xsum_ref[1]
    out_ref[0] = scale * (p1 - p2) + const * (cr - ci)
    out_ref[1] = scale * (p3 - p1 - p2) + const * (cr + ci)


# ----------------------------- tiling helpers ------------------------------- #

def _tpu_budget_and_o_target():
    """Generation-aware scoped-VMEM budget and output-channel tile target."""
    kind = ""
    try:
        kind = jax.devices()[0].device_kind.lower()
    except Exception:
        pass
    if "v5" in kind or "v6" in kind:            # 128 MiB physical VMEM
        return 64 * 1024 * 1024, 64
    return 32 * 1024 * 1024, 32                 # v7x (64 MiB physical) / unknown: conservative


def _maybe_vmem_limit(block_bytes, budget):
    need = 2 * block_bytes                      # double-buffered pipeline
    if need <= 12 * 1024 * 1024:
        return None                             # default scoped limit is plenty
    return int(min(budget, need + (4 << 20)))


def _pick_o_tile(out_channels, target):
    """Full O when small / not 32-divisible, else the largest multiple-of-32 divisor
    <= target (int8 sublane tile is (32,128); TO = 8/16/24 leaves weight vregs empty)."""
    if out_channels <= target or out_channels % 32 != 0:
        return out_channels
    best = out_channels
    for t in range(32, target + 1, 32):
        if out_channels % t == 0:
            best = t
    return best


# ----------------------------- kernel wrappers ------------------------------ #

def _spectral_modes_vpu(x_ri, x_sum, qw_ri, scales, mins):
    """x_ri: f32 [2,2,I,B,Mp]; x_sum: f32 [2,2,B,Mp]; qw_ri: i8 [2,2,I,O,Mp]
    -> f32 [2,2,B,O,Mp]."""
    _, _, n_in, b, mp = x_ri.shape
    n_out = qw_ri.shape[3]
    budget, o_target = _tpu_budget_and_o_target()
    to = _pick_o_tile(n_out, o_target)
    n_ot = n_out // to

    consts = tuple(127.0 * float(s) + float(m) for s, m in zip(scales, mins))
    kernel = functools.partial(
        _spectral_vpu_kernel,
        scales=tuple(float(s) for s in scales),
        consts=consts,
        unroll=max(1, min(4, n_in)),
    )

    block_bytes = (2 * n_in * b * mp * 4 + 2 * b * mp * 4
                   + 2 * n_in * to * mp * 1 + 2 * b * to * mp * 4)
    # TODO(synk): add a B-tiling grid axis if the resident x block alone gets large
    #             relative to v7x's 64 MiB physical VMEM.
    return pl.pallas_call(
        kernel,
        out_shape=jax.ShapeDtypeStruct((2, 2, b, n_out, mp), jnp.float32),
        grid=(2, n_ot),
        in_specs=[
            pl.BlockSpec((None, 2, n_in, b, mp), lambda c, ot: (c, 0, 0, 0, 0)),
            pl.BlockSpec((None, 2, b, mp), lambda c, ot: (c, 0, 0, 0)),
            pl.BlockSpec((None, 2, n_in, to, mp), lambda c, ot: (c, 0, 0, ot, 0)),
        ],
        out_specs=pl.BlockSpec((None, 2, b, to, mp), lambda c, ot: (c, 0, 0, ot, 0)),
        compiler_params=pltpu.CompilerParams(
            dimension_semantics=("parallel", "parallel"),
            vmem_limit_bytes=_maybe_vmem_limit(block_bytes, budget)),
    )(x_ri, x_sum, qw_ri)


def _spectral_modes_mxu(x_ri, x_sum, qw_ri, scales, mins, *, m_tile=128):
    """x_ri: f32 [2,2,Mp,B,I]; x_sum: f32 [2,2,Mp,B,1]; qw_ri: i8 [2,2,Mp,I,O]
    -> f32 [2,2,Mp,B,O]."""
    _, _, mp, b, n_in = x_ri.shape
    n_out = qw_ri.shape[4]
    budget, _ = _tpu_budget_and_o_target()
    tm = min(m_tile, mp)                         # Mp is a multiple of 128, so tm | Mp
    n_mt = mp // tm

    consts = tuple(127.0 * float(s) + float(m) for s, m in zip(scales, mins))
    kernel = functools.partial(
        _spectral_mxu_kernel,
        scales=tuple(float(s) for s in scales),
        consts=consts,
    )

    block_bytes = (2 * tm * b * n_in * 4 + 2 * tm * b * 4
                   + 2 * tm * n_in * n_out * 1 + 2 * tm * b * n_out * 4)
    return pl.pallas_call(
        kernel,
        out_shape=jax.ShapeDtypeStruct((2, 2, mp, b, n_out), jnp.float32),
        grid=(2, n_mt),
        in_specs=[
            pl.BlockSpec((None, 2, tm, b, n_in), lambda c, mt: (c, 0, mt, 0, 0)),
            pl.BlockSpec((None, 2, tm, b, 1), lambda c, mt: (c, 0, mt, 0, 0)),
            pl.BlockSpec((None, 2, tm, n_in, n_out), lambda c, mt: (c, 0, mt, 0, 0)),
        ],
        out_specs=pl.BlockSpec((None, 2, tm, b, n_out), lambda c, mt: (c, 0, mt, 0, 0)),
        compiler_params=pltpu.CompilerParams(
            dimension_semantics=("parallel", "parallel"),
            vmem_limit_bytes=_maybe_vmem_limit(block_bytes, budget)),
    )(x_ri, x_sum, qw_ri)


# --------------------------- module glue (JAX) ------------------------------ #

def quantize_tensor_int8(w):
    """Mirror of the module's _quantize_tensor_int16 (which actually emits int8)."""
    val_min = float(jnp.min(w))
    val_max = float(jnp.max(w))
    scale = (val_max - val_min) / 256.0
    if scale == 0.0:
        scale = 1.0
    q = jnp.clip(jnp.round((w - val_min) / scale - 127.0), -128, 127).astype(jnp.int8)
    return q, scale, val_min


def dequantize_int8(q, scale, min_val):
    return (q.astype(jnp.float32) + 127.0) * scale + min_val


def init_params(key, in_channels, out_channels, modes1, modes2):
    k1, k2 = jax.random.split(key)
    wscale = 1.0 / (in_channels * out_channels)
    w1 = wscale * jax.random.uniform(
        k1, (in_channels, out_channels, modes1, modes2, 2), jnp.float32)
    w2 = wscale * jax.random.uniform(
        k2, (in_channels, out_channels, modes1, modes2, 2), jnp.float32)
    q_w1, s1, m1 = quantize_tensor_int8(w1)
    q_w2, s2, m2 = quantize_tensor_int8(w2)
    # [corner, re/im, I, O, modes1, modes2] int8 (re/im off the trailing axis so the
    # kernels see lane-dense flattened modes).
    q_w = jnp.stack([jnp.moveaxis(q_w1, -1, 0), jnp.moveaxis(q_w2, -1, 0)], axis=0)
    return {"q_w": q_w, "w1_scale": s1, "w1_min": m1, "w2_scale": s2, "w2_min": m2}


def quantized_spectral_conv2d_v2_forward(x, q_w, scales, mins, out_channels,
                                         modes1, modes2, use_mxu=None):
    """Forward pass matching QuantizedSpectralConv2dV2.forward.

    NOTE: scales/mins are baked in as trace-time constants -> re-quantizing the
    weights requires retracing this function.
    """
    b, c, h, w = x.shape
    wf = w // 2 + 1
    dtype = x.dtype
    m = modes1 * modes2
    mp = _round_up(m, LANE)                    # lane-dense minor dim (multiple of 128)

    if use_mxu is None:
        use_mxu = min(c, out_channels) >= 32   # MXU path pays off at production channels

    # TODO(synk): rfft2/irfft2 stay in jnp.fft (XLA); no clean Pallas equivalent.
    x_ft = jnp.fft.rfft2(x.astype(jnp.float32), axes=(-2, -1), norm="ortho")

    x1 = x_ft[:, :, :modes1, :modes2]
    x2 = x_ft[:, :, h - modes1:, :modes2]
    xc = jnp.stack([x1, x2], axis=0)                               # [2,B,C,m1,m2] c64
    x_ri = jnp.stack([jnp.real(xc), jnp.imag(xc)], axis=1)         # [2,2,B,C,m1,m2] f32
    x_ri = x_ri.reshape(2, 2, b, c, m)
    x_ri = jnp.pad(x_ri, ((0, 0),) * 4 + ((0, mp - m),))           # zero-pad modes

    qw_ri = q_w.reshape(2, 2, c, out_channels, m)
    qw_ri = jnp.pad(qw_ri, ((0, 0),) * 4 + ((0, mp - m),))         # int8 stays int8

    # Hoisted affine-correction sums (same for re/im: joint (scale,min) per corner).
    x_sum = jnp.sum(x_ri, axis=3)                                  # [2,2,B,Mp]

    if use_mxu:
        x_in = jnp.transpose(x_ri, (0, 1, 4, 2, 3))                # [2,2,Mp,B,C]
        qw_in = jnp.transpose(qw_ri, (0, 1, 4, 2, 3))              # [2,2,Mp,C,O]
        xs_in = jnp.transpose(x_sum, (0, 1, 3, 2))[..., None]      # [2,2,Mp,B,1]
        out = _spectral_modes_mxu(x_in, xs_in, qw_in, scales, mins)
        out = jnp.transpose(out, (0, 1, 3, 4, 2))[..., :m]         # [2,2,B,O,M]
    else:
        x_in = jnp.transpose(x_ri, (0, 1, 3, 2, 4))                # [2,2,C,B,Mp]
        out = _spectral_modes_vpu(x_in, x_sum, qw_ri, scales, mins)
        out = out[..., :m]                                         # [2,2,B,O,M]

    out_r = out[:, 0].reshape(2, b, out_channels, modes1, modes2)
    out_i = out[:, 1].reshape(2, b, out_channels, modes1, modes2)
    out_c = out_r + 1j * out_i

    out_ft = jnp.zeros((b, out_channels, h, wf), dtype=jnp.complex64)
    out_ft = out_ft.at[:, :, :modes1, :modes2].set(out_c[0])
    out_ft = out_ft.at[:, :, h - modes1:, :modes2].set(out_c[1])
    return jnp.fft.irfft2(out_ft, s=(h, w), axes=(-2, -1), norm="ortho").astype(dtype)


# ------------------------- pure-JAX reference check ------------------------- #

def _ref_forward(x, params, out_channels, modes1, modes2):
    b, c, h, w = x.shape
    wf = w // 2 + 1
    hi = lax.Precision.HIGHEST
    x_ft = jnp.fft.rfft2(x.astype(jnp.float32), axes=(-2, -1), norm="ortho")

    def compl_mul(a, wr, wi):
        ar, ai = jnp.real(a), jnp.imag(a)
        outr = (jnp.einsum("bixy,ioxy->boxy", ar, wr, precision=hi)
                - jnp.einsum("bixy,ioxy->boxy", ai, wi, precision=hi))
        outi = (jnp.einsum("bixy,ioxy->boxy", ai, wr, precision=hi)
                + jnp.einsum("bixy,ioxy->boxy", ar, wi, precision=hi))
        return outr + 1j * outi

    w1r = dequantize_int8(params["q_w"][0, 0], params["w1_scale"], params["w1_min"])
    w1i = dequantize_int8(params["q_w"][0, 1], params["w1_scale"], params["w1_min"])
    w2r = dequantize_int8(params["q_w"][1, 0], params["w2_scale"], params["w2_min"])
    w2i = dequantize_int8(params["q_w"][1, 1], params["w2_scale"], params["w2_min"])

    out_ft = jnp.zeros((b, out_channels, h, wf), dtype=jnp.complex64)
    out_ft = out_ft.at[:, :, :modes1, :modes2].set(
        compl_mul(x_ft[:, :, :modes1, :modes2], w1r, w1i))
    out_ft = out_ft.at[:, :, h - modes1:, :modes2].set(
        compl_mul(x_ft[:, :, h - modes1:, :modes2], w2r, w2i))
    return jnp.fft.irfft2(out_ft, s=(h, w), axes=(-2, -1), norm="ortho").astype(x.dtype)


# ----------------------------------- main ----------------------------------- #

if __name__ == "__main__":
    key = jax.random.PRNGKey(0)
    k1, k2, k3, k4 = jax.random.split(key, 4)

    h = w = 16
    m1 = m2 = 4

    # --- check 1: tiny channels -> lane-dense VPU path ----------------------- #
    b, cin, cout = 2, 4, 4
    x = jax.random.normal(k1, (b, cin, h, w), dtype=jnp.float32)
    params = init_params(k2, cin, cout, m1, m2)
    scales = (params["w1_scale"], params["w2_scale"])
    mins = (params["w1_min"], params["w2_min"])
    fwd = jax.jit(lambda xx, qw: quantized_spectral_conv2d_v2_forward(
        xx, qw, scales, mins, cout, m1, m2))
    y = jax.block_until_ready(fwd(x, params["q_w"]))
    y_ref = jax.block_until_ready(_ref_forward(x, params, cout, m1, m2))
    assert y.shape == (b, cout, h, w), y.shape
    assert y.dtype == x.dtype
    err = float(jnp.max(jnp.abs(y - y_ref)))
    assert jnp.allclose(y, y_ref, atol=2e-4, rtol=2e-4), err

    # --- check 2: larger channels -> batched-MXU (3-matmul) path ------------- #
    b2, cin2, cout2 = 2, 32, 32
    x2 = jax.random.normal(k3, (b2, cin2, h, w), dtype=jnp.float32)
    params2 = init_params(k4, cin2, cout2, m1, m2)
    scales2 = (params2["w1_scale"], params2["w2_scale"])
    mins2 = (params2["w1_min"], params2["w2_min"])
    fwd2 = jax.jit(lambda xx, qw: quantized_spectral_conv2d_v2_forward(
        xx, qw, scales2, mins2, cout2, m1, m2))
    y2 = jax.block_until_ready(fwd2(x2, params2["q_w"]))
    y2_ref = jax.block_until_ready(_ref_forward(x2, params2, cout2, m1, m2))
    assert y2.shape == (b2, cout2, h, w), y2.shape
    err2 = float(jnp.max(jnp.abs(y2 - y2_ref)))
    assert jnp.allclose(y2, y2_ref, atol=2e-3, rtol=2e-2), err2

    print("KERNEL_OK")
</pallas_src>

<mosaic_0001>
module attributes {stable_mosaic.version = 11 : i64} {
  func.func @_spectral_vpu_kernel(%arg0: i32, %arg1: i32, %arg2: memref<1x2x4x2x128xf32, #tpu.memory_space<vmem>>, %arg3: memref<1x2x2x128xf32, #tpu.memory_space<vmem>>, %arg4: memref<1x2x4x4x128xi8, #tpu.memory_space<vmem>>, %arg5: memref<1x2x2x4x128xf32, #tpu.memory_space<vmem>>) attributes {dimension_semantics = [#tpu.dimension_semantics<parallel>, #tpu.dimension_semantics<parallel>], iteration_bounds = array<i64: 2, 1>, scalar_prefetch = 0 : i64, scratch_operands = 0 : i64, tpu.core_type = #tpu.core_type<tc>, window_params = [{transform_indices = @transform_0, window_bounds = array<i64: 1, 2, 4, 2, 128>}, {transform_indices = @transform_1, window_bounds = array<i64: 1, 2, 2, 128>}, {transform_indices = @transform_2, window_bounds = array<i64: 1, 2, 4, 4, 128>}, {transform_indices = @transform_3, window_bounds = array<i64: 1, 2, 2, 4, 128>}]} {
    %c0_i32 = arith.constant 0 : i32
    %0 = arith.cmpi eq, %arg0, %c0_i32 : i32
    %cst = arith.constant 2.43452756E-4 : f32
    %cst_0 = arith.constant 2.43597548E-4 : f32
    %1 = arith.select %0, %cst, %cst_0 : f32
    %c0_i32_1 = arith.constant 0 : i32
    %2 = arith.cmpi eq, %arg0, %c0_i32_1 : i32
    %cst_2 = arith.constant 0.0309835132 : f32
    %cst_3 = arith.constant 0.0309961587 : f32
    %3 = arith.select %2, %cst_2, %cst_3 : f32
    %cst_4 = arith.constant 0.000000e+00 : f32
    %4 = vector.broadcast %cst_4 : f32 to vector<2x4x128xf32>
    %cst_5 = arith.constant 0.000000e+00 : f32
    %5 = vector.broadcast %cst_5 : f32 to vector<2x4x128xf32>
    %c0_i32_6 = arith.constant 0 : i32
    %c0 = arith.constant 0 : index
    %c0_7 = arith.constant 0 : index
    %6 = arith.index_cast %c0_i32_6 : i32 to index
    %c0_8 = arith.constant 0 : index
    %c0_9 = arith.constant 0 : index
    %7 = vector.load %arg2[%c0, %c0_7, %6, %c0_8, %c0_9] : memref<1x2x4x2x128xf32, #tpu.memory_space<vmem>>, vector<1x1x1x2x128xf32>
    %8 = vector.shape_cast %7 : vector<1x1x1x2x128xf32> to vector<2x128xf32>
    %c0_10 = arith.constant 0 : index
    %c1 = arith.constant 1 : index
    %9 = arith.index_cast %c0_i32_6 : i32 to index
    %c0_11 = arith.constant 0 : index
    %c0_12 = arith.constant 0 : index
    %10 = vector.load %arg2[%c0_10, %c1, %9, %c0_11, %c0_12] : memref<1x2x4x2x128xf32, #tpu.memory_space<vmem>>, vector<1x1x1x2x128xf32>
    %11 = vector.shape_cast %10 : vector<1x1x1x2x128xf32> to vector<2x128xf32>
    %c0_13 = arith.constant 0 : index
    %c0_14 = arith.constant 0 : index
    %12 = arith.index_cast %c0_i32_6 : i32 to index
    %c0_15 = arith.constant 0 : index
    %c0_16 = arith.constant 0 : index
    %13 = vector.load %arg4[%c0_13, %c0_14, %12, %c0_15, %c0_16] : memref<1x2x4x4x128xi8, #tpu.memory_space<vmem>>, vector<1x1x1x4x128xi8>
    %14 = vector.shape_cast %13 : vector<1x1x1x4x128xi8> to vector<4x128xi8>
    %15 = arith.sitofp %14 : vector<4x128xi8> to vector<4x128xf32>
    %c0_17 = arith.constant 0 : index
    %c1_18 = arith.constant 1 : index
    %16 = arith.index_cast %c0_i32_6 : i32 to index
    %c0_19 = arith.constant 0 : index
    %c0_20 = arith.constant 0 : index
    %17 = vector.load %arg4[%c0_17, %c1_18, %16, %c0_19, %c0_20] : memref<1x2x4x4x128xi8, #tpu.memory_space<vmem>>, vector<1x1x1x4x128xi8>
    %18 = vector.shape_cast %17 : vector<1x1x1x4x128xi8> to vector<4x128xi8>
    %19 = arith.sitofp %18 : vector<4x128xi8> to vector<4x128xf32>
    %20 = vector.shape_cast %8 : vector<2x128xf32> to vector<2x1x128xf32>
    %21 = vector.shape_cast %15 : vector<4x128xf32> to vector<1x4x128xf32>
    %22 = vector.broadcast %20 : vector<2x1x128xf32> to vector<2x4x128xf32>
    %23 = vector.broadcast %21 : vector<1x4x128xf32> to vector<2x4x128xf32>
    %24 = arith.mulf %22, %23 : vector<2x4x128xf32>
    %25 = arith.addf %4, %24 : vector<2x4x128xf32>
    %26 = vector.shape_cast %11 : vector<2x128xf32> to vector<2x1x128xf32>
    %27 = vector.shape_cast %19 : vector<4x128xf32> to vector<1x4x128xf32>
    %28 = vector.broadcast %26 : vector<2x1x128xf32> to vector<2x4x128xf32>
    %29 = vector.broadcast %27 : vector<1x4x128xf32> to vector<2x4x128xf32>
    %30 = arith.mulf %28, %29 : vector<2x4x128xf32>
    %31 = arith.subf %25, %30 : vector<2x4x128xf32>
    %32 = vector.shape_cast %11 : vector<2x128xf32> to vector<2x1x128xf32>
    %33 = vector.shape_cast %15 : vector<4x128xf32> to vector<1x4x128xf32>
    %34 = vector.broadcast %32 : vector<2x1x128xf32> to vector<2x4x128xf32>
    %35 = vector.broadcast %33 : vector<1x4x128xf32> to vector<2x4x128xf32>
    %36 = arith.mulf %34, %35 : vector<2x4x128xf32>
    %37 = arith.addf %5, %36 : vector<2x4x128xf32>
    %38 = vector.shape_cast %8 : vector<2x128xf32> to vector<2x1x128xf32>
    %39 = vector.shape_cast %19 : vector<4x128xf32> to vector<1x4x128xf32>
    %40 = vector.broadcast %38 : vector<2x1x128xf32> to vector<2x4x128xf32>
    %41 = vector.broadcast %39 : vector<1x4x128xf32> to vector<2x4x128xf32>
    %42 = arith.mulf %40, %41 : vector<2x4x128xf32>
    %43 = arith.addf %37, %42 : vector<2x4x128xf32>
    %c1_i32 = arith.constant 1 : i32
    %c0_21 = arith.constant 0 : index
    %c0_22 = arith.constant 0 : index
    %44 = arith.index_cast %c1_i32 : i32 to index
    %c0_23 = arith.constant 0 : index
    %c0_24 = arith.constant 0 : index
    %45 = vector.load %arg2[%c0_21, %c0_22, %44, %c0_23, %c0_24] : memref<1x2x4x2x128xf32, #tpu.memory_space<vmem>>, vector<1x1x1x2x128xf32>
    %46 = vector.shape_cast %45 : vector<1x1x1x2x128xf32> to vector<2x128xf32>
    %c0_25 = arith.constant 0 : index
    %c1_26 = arith.constant 1 : index
    %47 = arith.index_cast %c1_i32 : i32 to index
    %c0_27 = arith.constant 0 : index
    %c0_28 = arith.constant 0 : index
    %48 = vector.load %arg2[%c0_25, %c1_26, %47, %c0_27, %c0_28] : memref<1x2x4x2x128xf32, #tpu.memory_space<vmem>>, vector<1x1x1x2x128xf32>
    %49 = vector.shape_cast %48 : vector<1x1x1x2x128xf32> to vector<2x128xf32>
    %c0_29 = arith.constant 0 : index
    %c0_30 = arith.constant 0 : index
    %50 = arith.index_cast %c1_i32 : i32 to index
    %c0_31 = arith.constant 0 : index
    %c0_32 = arith.constant 0 : index
    %51 = vector.load %arg4[%c0_29, %c0_30, %50, %c0_31, %c0_32] : memref<1x2x4x4x128xi8, #tpu.memory_space<vmem>>, vector<1x1x1x4x128xi8>
    %52 = vector.shape_cast %51 : vector<1x1x1x4x128xi8> to vector<4x128xi8>
    %53 = arith.sitofp %52 : vector<4x128xi8> to vector<4x128xf32>
    %c0_33 = arith.constant 0 : index
    %c1_34 = arith.constant 1 : index
    %54 = arith.index_cast %c1_i32 : i32 to index
    %c0_35 = arith.constant 0 : index
    %c0_36 = arith.constant 0 : index
    %55 = vector.load %arg4[%c0_33, %c1_34, %54, %c0_35, %c0_36] : memref<1x2x4x4x128xi8, #tpu.memory_space<vmem>>, vector<1x1x1x4x128xi8>
    %56 = vector.shape_cast %55 : vector<1x1x1x4x128xi8> to vector<4x128xi8>
    %57 = arith.sitofp %56 : vector<4x128xi8> to vector<4x128xf32>
    %58 = vector.shape_cast %46 : vector<2x128xf32> to vector<2x1x128xf32>
    %59 = vector.shape_cast %53 : vector<4x128xf32> to vector<1x4x128xf32>
    %60 = vector.broadcast %58 : vector<2x1x128xf32> to vector<2x4x128xf32>
    %61 = vector.broadcast %59 : vector<1x4x128xf32> to vector<2x4x128xf32>
    %62 = arith.mulf %60, %61 : vector<2x4x128xf32>
    %63 = arith.addf %31, %62 : vector<2x4x128xf32>
    %64 = vector.shape_cast %49 : vector<2x128xf32> to vector<2x1x128xf32>
    %65 = vector.shape_cast %57 : vector<4x128xf32> to vector<1x4x128xf32>
    %66 = vector.broadcast %64 : vector<2x1x128xf32> to vector<2x4x128xf32>
    %67 = vector.broadcast %65 : vector<1x4x128xf32> to vector<2x4x128xf32>
    %68 = arith.mulf %66, %67 : vector<2x4x128xf32>
    %69 = arith.subf %63, %68 : vector<2x4x128xf32>
    %70 = vector.shape_cast %49 : vector<2x128xf32> to vector<2x1x128xf32>
    %71 = vector.shape_cast %53 : vector<4x128xf32> to vector<1x4x128xf32>
    %72 = vector.broadcast %70 : vector<2x1x128xf32> to vector<2x4x128xf32>
    %73 = vector.broadcast %71 : vector<1x4x128xf32> to vector<2x4x128xf32>
    %74 = arith.mulf %72, %73 : vector<2x4x128xf32>
    %75 = arith.addf %43, %74 : vector<2x4x128xf32>
    %76 = vector.shape_cast %46 : vector<2x128xf32> to vector<2x1x128xf32>
    %77 = vector.shape_cast %57 : vector<4x128xf32> to vector<1x4x128xf32>
    %78 = vector.broadcast %76 : vector<2x1x128xf32> to vector<2x4x128xf32>
    %79 = vector.broadcast %77 : vector<1x4x128xf32> to vector<2x4x128xf32>
    %80 = arith.mulf %78, %79 : vector<2x4x128xf32>
    %81 = arith.addf %75, %80 : vector<2x4x128xf32>
    %c2_i32 = arith.constant 2 : i32
    %c0_37 = arith.constant 0 : index
    %c0_38 = arith.constant 0 : index
    %82 = arith.index_cast %c2_i32 : i32 to index
    %c0_39 = arith.constant 0 : index
    %c0_40 = arith.constant 0 : index
    %83 = vector.load %arg2[%c0_37, %c0_38, %82, %c0_39, %c0_40] : memref<1x2x4x2x128xf32, #tpu.memory_space<vmem>>, vector<1x1x1x2x128xf32>
    %84 = vector.shape_cast %83 : vector<1x1x1x2x128xf32> to vector<2x128xf32>
    %c0_41 = arith.constant 0 : index
    %c1_42 = arith.constant 1 : index
    %85 = arith.index_cast %c2_i32 : i32 to index
    %c0_43 = arith.constant 0 : index
    %c0_44 = arith.constant 0 : index
    %86 = vector.load %arg2[%c0_41, %c1_42, %85, %c0_43, %c0_44] : memref<1x2x4x2x128xf32, #tpu.memory_space<vmem>>, vector<1x1x1x2x128xf32>
    %87 = vector.shape_cast %86 : vector<1x1x1x2x128xf32> to vector<2x128xf32>
    %c0_45 = arith.constant 0 : index
    %c0_46 = arith.constant 0 : index
    %88 = arith.index_cast %c2_i32 : i32 to index
    %c0_47 = arith.constant 0 : index
    %c0_48 = arith.constant 0 : index
    %89 = vector.load %arg4[%c0_45, %c0_46, %88, %c0_47, %c0_48] : memref<1x2x4x4x128xi8, #tpu.memory_space<vmem>>, vector<1x1x1x4x128xi8>
    %90 = vector.shape_cast %89 : vector<1x1x1x4x128xi8> to vector<4x128xi8>
    %91 = arith.sitofp %90 : vector<4x128xi8> to vector<4x128xf32>
    %c0_49 = arith.constant 0 : index
    %c1_50 = arith.constant 1 : index
    %92 = arith.index_cast %c2_i32 : i32 to index
    %c0_51 = arith.constant 0 : index
    %c0_52 = arith.constant 0 : index
    %93 = vector.load %arg4[%c0_49, %c1_50, %92, %c0_51, %c0_52] : memref<1x2x4x4x128xi8, #tpu.memory_space<vmem>>, vector<1x1x1x4x128xi8>
    %94 = vector.shape_cast %93 : vector<1x1x1x4x128xi8> to vector<4x128xi8>
    %95 = arith.sitofp %94 : vector<4x128xi8> to vector<4x128xf32>
    %96 = vector.shape_cast %84 : vector<2x128xf32> to vector<2x1x128xf32>
    %97 = vector.shape_cast %91 : vector<4x128xf32> to vector<1x4x128xf32>
    %98 = vector.broadcast %96 : vector<2x1x128xf32> to vector<2x4x128xf32>
    %99 = vector.broadcast %97 : vector<1x4x128xf32> to vector<2x4x128xf32>
    %100 = arith.mulf %98, %99 : vector<2x4x128xf32>
    %101 = arith.addf %69, %100 : vector<2x4x128xf32>
    %102 = vector.shape_cast %87 : vector<2x128xf32> to vector<2x1x128xf32>
    %103 = vector.shape_cast %95 : vector<4x128xf32> to vector<1x4x128xf32>
    %104 = vector.broadcast %102 : vector<2x1x128xf32> to vector<2x4x128xf32>
    %105 = vector.broadcast %103 : vector<1x4x128xf32> to vector<2x4x128xf32>
    %106 = arith.mulf %104, %105 : vector<2x4x128xf32>
    %107 = arith.subf %101, %106 : vector<2x4x128xf32>
    %108 = vector.shape_cast %87 : vector<2x128xf32> to vector<2x1x128xf32>
    %109 = vector.shape_cast %91 : vector<4x128xf32> to vector<1x4x128xf32>
    %110 = vector.broadcast %108 : vector<2x1x128xf32> to vector<2x4x128xf32>
    %111 = vector.broadcast %109 : vector<1x4x128xf32> to vector<2x4x128xf32>
    %112 = arith.mulf %110, %111 : vector<2x4x128xf32>
    %113 = arith.addf %81, %112 : vector<2x4x128xf32>
    %114 = vector.shape_cast %84 : vector<2x128xf32> to vector<2x1x128xf32>
    %115 = vector.shape_cast %95 : vector<4x128xf32> to vector<1x4x128xf32>
    %116 = vector.broadcast %114 : vector<2x1x128xf32> to vector<2x4x128xf32>
    %117 = vector.broadcast %115 : vector<1x4x128xf32> to vector<2x4x128xf32>
    %118 = arith.mulf %116, %117 : vector<2x4x128xf32>
    %119 = arith.addf %113, %118 : vector<2x4x128xf32>
    %c3_i32 = arith.constant 3 : i32
    %c0_53 = arith.constant 0 : index
    %c0_54 = arith.constant 0 : index
    %120 = arith.index_cast %c3_i32 : i32 to index
    %c0_55 = arith.constant 0 : index
    %c0_56 = arith.constant 0 : index
    %121 = vector.load %arg2[%c0_53, %c0_54, %120, %c0_55, %c0_56] : memref<1x2x4x2x128xf32, #tpu.memory_space<vmem>>, vector<1x1x1x2x128xf32>
    %122 = vector.shape_cast %121 : vector<1x1x1x2x128xf32> to vector<2x128xf32>
    %c0_57 = arith.constant 0 : index
    %c1_58 = arith.constant 1 : index
    %123 = arith.index_cast %c3_i32 : i32 to index
    %c0_59 = arith.constant 0 : index
    %c0_60 = arith.constant 0 : index
    %124 = vector.load %arg2[%c0_57, %c1_58, %123, %c0_59, %c0_60] : memref<1x2x4x2x128xf32, #tpu.memory_space<vmem>>, vector<1x1x1x2x128xf32>
    %125 = vector.shape_cast %124 : vector<1x1x1x2x128xf32> to vector<2x128xf32>
    %c0_61 = arith.constant 0 : index
    %c0_62 = arith.constant 0 : index
    %126 = arith.index_cast %c3_i32 : i32 to index
    %c0_63 = arith.constant 0 : index
    %c0_64 = arith.constant 0 : index
    %127 = vector.load %arg4[%c0_61, %c0_62, %126, %c0_63, %c0_64] : memref<1x2x4x4x128xi8, #tpu.memory_space<vmem>>, vector<1x1x1x4x128xi8>
    %128 = vector.shape_cast %127 : vector<1x1x1x4x128xi8> to vector<4x128xi8>
    %129 = arith.sitofp %128 : vector<4x128xi8> to vector<4x128xf32>
    %c0_65 = arith.constant 0 : index
    %c1_66 = arith.constant 1 : index
    %130 = arith.index_cast %c3_i32 : i32 to index
    %c0_67 = arith.constant 0 : index
    %c0_68 = arith.constant 0 : index
    %131 = vector.load %arg4[%c0_65, %c1_66, %130, %c0_67, %c0_68] : memref<1x2x4x4x128xi8, #tpu.memory_space<vmem>>, vector<1x1x1x4x128xi8>
    %132 = vector.shape_cast %131 : vector<1x1x1x4x128xi8> to vector<4x128xi8>
    %133 = arith.sitofp %132 : vector<4x128xi8> to vector<4x128xf32>
    %134 = vector.shape_cast %122 : vector<2x128xf32> to vector<2x1x128xf32>
    %135 = vector.shape_cast %129 : vector<4x128xf32> to vector<1x4x128xf32>
    %136 = vector.broadcast %134 : vector<2x1x128xf32> to vector<2x4x128xf32>
    %137 = vector.broadcast %135 : vector<1x4x128xf32> to vector<2x4x128xf32>
    %138 = arith.mulf %136, %137 : vector<2x4x128xf32>
    %139 = arith.addf %107, %138 : vector<2x4x128xf32>
    %140 = vector.shape_cast %125 : vector<2x128xf32> to vector<2x1x128xf32>
    %141 = vector.shape_cast %133 : vector<4x128xf32> to vector<1x4x128xf32>
    %142 = vector.broadcast %140 : vector<2x1x128xf32> to vector<2x4x128xf32>
    %143 = vector.broadcast %141 : vector<1x4x128xf32> to vector<2x4x128xf32>
    %144 = arith.mulf %142, %143 : vector<2x4x128xf32>
    %145 = arith.subf %139, %144 : vector<2x4x128xf32>
    %146 = vector.shape_cast %125 : vector<2x128xf32> to vector<2x1x128xf32>
    %147 = vector.shape_cast %129 : vector<4x128xf32> to vector<1x4x128xf32>
    %148 = vector.broadcast %146 : vector<2x1x128xf32> to vector<2x4x128xf32>
    %149 = vector.broadcast %147 : vector<1x4x128xf32> to vector<2x4x128xf32>
    %150 = arith.mulf %148, %149 : vector<2x4x128xf32>
    %151 = arith.addf %119, %150 : vector<2x4x128xf32>
    %152 = vector.shape_cast %122 : vector<2x128xf32> to vector<2x1x128xf32>
    %153 = vector.shape_cast %133 : vector<4x128xf32> to vector<1x4x128xf32>
    %154 = vector.broadcast %152 : vector<2x1x128xf32> to vector<2x4x128xf32>
    %155 = vector.broadcast %153 : vector<1x4x128xf32> to vector<2x4x128xf32>
    %156 = arith.mulf %154, %155 : vector<2x4x128xf32>
    %157 = arith.addf %151, %156 : vector<2x4x128xf32>
    %c4_i32 = arith.constant 4 : i32
    %c0_69 = arith.constant 0 : index
    %c0_70 = arith.constant 0 : index
    %c0_71 = arith.constant 0 : index
    %c0_72 = arith.constant 0 : index
    %158 = vector.load %arg3[%c0_69, %c0_70, %c0_71, %c0_72] : memref<1x2x2x128xf32, #tpu.memory_space<vmem>>, vector<1x1x2x128xf32>
    %159 = vector.shape_cast %158 : vector<1x1x2x128xf32> to vector<2x128xf32>
    %160 = vector.shape_cast %159 : vector<2x128xf32> to vector<2x1x128xf32>
    %c0_73 = arith.constant 0 : index
    %c1_74 = arith.constant 1 : index
    %c0_75 = arith.constant 0 : index
    %c0_76 = arith.constant 0 : index
    %161 = vector.load %arg3[%c0_73, %c1_74, %c0_75, %c0_76] : memref<1x2x2x128xf32, #tpu.memory_space<vmem>>, vector<1x1x2x128xf32>
    %162 = vector.shape_cast %161 : vector<1x1x2x128xf32> to vector<2x128xf32>
    %163 = vector.shape_cast %162 : vector<2x128xf32> to vector<2x1x128xf32>
    %164 = vector.broadcast %1 : f32 to vector<2x4x128xf32>
    %165 = arith.mulf %164, %145 : vector<2x4x128xf32>
    %166 = arith.subf %160, %163 : vector<2x1x128xf32>
    %167 = vector.broadcast %3 : f32 to vector<2x1x128xf32>
    %168 = arith.mulf %167, %166 : vector<2x1x128xf32>
    %169 = vector.broadcast %168 : vector<2x1x128xf32> to vector<2x4x128xf32>
    %170 = arith.addf %165, %169 : vector<2x4x128xf32>
    %c0_77 = arith.constant 0 : index
    %c0_78 = arith.constant 0 : index
    %c0_79 = arith.constant 0 : index
    %c0_80 = arith.constant 0 : index
    %c0_81 = arith.constant 0 : index
    %171 = vector.load %arg5[%c0_77, %c0_78, %c0_79, %c0_80, %c0_81] : memref<1x2x2x4x128xf32, #tpu.memory_space<vmem>>, vector<1x1x2x4x128xf32>
    %172 = vector.shape_cast %171 : vector<1x1x2x4x128xf32> to vector<2x4x128xf32>
    %173 = vector.shape_cast %170 : vector<2x4x128xf32> to vector<1x1x2x4x128xf32>
    tpu.vector_store %arg5[%c0_77, %c0_78, %c0_79, %c0_80, %c0_81], %173 {strides = array<i32>} : memref<1x2x2x4x128xf32, #tpu.memory_space<vmem>>, vector<1x1x2x4x128xf32>,
    %174 = vector.broadcast %1 : f32 to vector<2x4x128xf32>
    %175 = arith.mulf %174, %157 : vector<2x4x128xf32>
    %176 = arith.addf %160, %163 : vector<2x1x128xf32>
    %177 = vector.broadcast %3 : f32 to vector<2x1x128xf32>
    %178 = arith.mulf %177, %176 : vector<2x1x128xf32>
    %179 = vector.broadcast %178 : vector<2x1x128xf32> to vector<2x4x128xf32>
    %180 = arith.addf %175, %179 : vector<2x4x128xf32>
    %c0_82 = arith.constant 0 : index
    %c1_83 = arith.constant 1 : index
    %c0_84 = arith.constant 0 : index
    %c0_85 = arith.constant 0 : index
    %c0_86 = arith.constant 0 : index
    %181 = vector.load %arg5[%c0_82, %c1_83, %c0_84, %c0_85, %c0_86] : memref<1x2x2x4x128xf32, #tpu.memory_space<vmem>>, vector<1x1x2x4x128xf32>
    %182 = vector.shape_cast %181 : vector<1x1x2x4x128xf32> to vector<2x4x128xf32>
    %183 = vector.shape_cast %180 : vector<2x4x128xf32> to vector<1x1x2x4x128xf32>
    tpu.vector_store %arg5[%c0_82, %c1_83, %c0_84, %c0_85, %c0_86], %183 {strides = array<i32>} : memref<1x2x2x4x128xf32, #tpu.memory_space<vmem>>, vector<1x1x2x4x128xf32>,
    return
  }
  func.func @transform_0(%arg0: i32, %arg1: i32) -> (i32, i32, i32, i32, i32) {
    %c0_i32 = arith.constant 0 : i32
    %c0_i32_0 = arith.constant 0 : i32
    %c0_i32_1 = arith.constant 0 : i32
    %c0_i32_2 = arith.constant 0 : i32
    %c0_i32_3 = arith.constant 0 : i32
    return %arg0, %c0_i32, %c0_i32_0, %c0_i32_1, %c0_i32_2 : i32, i32, i32, i32, i32
  }
  func.func @transform_1(%arg0: i32, %arg1: i32) -> (i32, i32, i32, i32) {
    %c0_i32 = arith.constant 0 : i32
    %c0_i32_0 = arith.constant 0 : i32
    %c0_i32_1 = arith.constant 0 : i32
    %c0_i32_2 = arith.constant 0 : i32
    return %arg0, %c0_i32, %c0_i32_0, %c0_i32_1 : i32, i32, i32, i32
  }
  func.func @transform_2(%arg0: i32, %arg1: i32) -> (i32, i32, i32, i32, i32) {
    %c0_i32 = arith.constant 0 : i32
    %c0_i32_0 = arith.constant 0 : i32
    %c0_i32_1 = arith.constant 0 : i32
    %c0_i32_2 = arith.constant 0 : i32
    return %arg0, %c0_i32, %c0_i32_0, %arg1, %c0_i32_1 : i32, i32, i32, i32, i32
  }
  func.func @transform_3(%arg0: i32, %arg1: i32) -> (i32, i32, i32, i32, i32) {
    %c0_i32 = arith.constant 0 : i32
    %c0_i32_0 = arith.constant 0 : i32
    %c0_i32_1 = arith.constant 0 : i32
    %c0_i32_2 = arith.constant 0 : i32
    return %arg0, %c0_i32, %c0_i32_0, %arg1, %c0_i32_1 : i32, i32, i32, i32, i32
  }
}

</mosaic_0001>

<bundles_post_ra>
// kernel: squeeze.4
= control target key start
LH: loop header
LB: loop body
LE: loop exit
PB: predicated region body
PF: predicated region fallthrough
CT: control target
= control target key end

     0   :  { %vm21_vm0 = vcmask 31744   ;;  %s222_s14 = smov 124   ;;  %s223_s15 = smov 116   ;;  %s310_s0 = inlined_call_operand.vmem [shape: f32[2,1,2,4,16], index: 0, kind: input, shape index: {}]   ;;  %s311_s1 = inlined_call_operand.vmem [shape: f32[2,2,4,4,4], index: 1, kind: output, shape index: {}]  }
   0x1   :  { %v202_v0 = vld [vmem:[%s310_s0 + $0x4] sm:$0xf]  ;;  %v18_v1 = vld [vmem:[%s310_s0] sm:$0xf]  ;;  %v200_v2 = vld [vmem:[%s310_s0 + $0xc] sm:$0xf] }
   0x2   :  { %17 = vst [vmem:[#allocation1 + $0x8] sm:$0xf] %v202_v0  ;;  %19 = vst [vmem:[#allocation1] sm:$0xf] %v18_v1  ;;  %v201_v3 = vld [vmem:[%s310_s0 + $0x8] sm:$0xf] }
   0x3   :  { %8 = vst [vmem:[#allocation1 + $0x18] sm:$0xf] %v200_v2  ;;  %13 = vst [vmem:[#allocation1 + $0x10] sm:$0xf] %v201_v3  ;;  %s221_s0 = smov 120  }
   0x9   :  { %v55_v4 = vld.sshfl [vmem:[#allocation1] sm:$0xff pattern:$0xba983210]  }
   0xa   :  { %v20_v5 = vld [vmem:[#allocation1] sm:$0xf]   ;;  %56 = vrot.lane.b32.xlu1 %v55_v4, %s221_s0  ;;  %39 = vrot.lane.b32.xlu0 %v55_v4, %s222_s14  ;;  %v24_v6 = vld [vmem:[#allocation1 + $0x8] sm:$0xf]   ;;  %v29_v8 = vld [vmem:[#allocation1 + $0x10] sm:$0xf]  }
   0xb   :  { %v64_v7 = vld.sshfl [vmem:[#allocation1 + $0x10] sm:$0xff pattern:$0xba983210]   ;;  %22 = vst.msk [vmem:[#allocation0] ss:$8 sm:$0xf] %vm21_vm0, %v20_v5  }
   0xc   :  { %27 = vst.msk [vmem:[#allocation0 + $0x20] ss:$8 sm:$0xf] %vm21_vm0, %v24_v6   ;;  %v34_v9 = vld [vmem:[#allocation1 + $0x18] sm:$0xf]  }
   0xd   :  { %32 = vst.msk [vmem:[#allocation0 + $0x40] ss:$8 sm:$0xf] %vm21_vm0, %v29_v8   ;;  %37 = vst.msk [vmem:[#allocation0 + $0x60] ss:$8 sm:$0xf] %vm21_vm0, %v34_v9  }
   0xe   :  { %65 = vrot.lane.b32.xlu1 %v64_v7, %s221_s0  ;;  %48 = vrot.lane.b32.xlu0 %v64_v7, %s222_s14 }
  0x12   :  { %82 = vrot.lane.b32.xlu1 %v64_v7, %s223_s15  ;;  %73 = vrot.lane.b32.xlu0 %v55_v4, %s223_s15 }
  0x7c   :  { %v57_v10 = vpop.permute.xlu1 %56   ;;  %v40_v11 = vpop.permute.xlu0 %39  }
  0x7d   :  { %60 = vst.msk [vmem:[#allocation0 + $0x2] ss:$8 sm:$0xf] %vm21_vm0, %v57_v10   ;;  %62 = vst.msk [vmem:[#allocation0 + $0x2] ss:$8 sm:$0xf0] %vm21_vm0, %v57_v10  }
  0x7e   :  { %43 = vst.msk [vmem:[#allocation0 + $0x1] ss:$8 sm:$0xf] %vm21_vm0, %v40_v11   ;;  %45 = vst.msk [vmem:[#allocation0 + $0x1] ss:$8 sm:$0xf0] %vm21_vm0, %v40_v11  }
  0x80   :  { %v66_v12 = vpop.permute.xlu1 %65   ;;  %v49_v13 = vpop.permute.xlu0 %48  }
  0x81   :  { %69 = vst.msk [vmem:[#allocation0 + $0x42] ss:$8 sm:$0xf] %vm21_vm0, %v66_v12   ;;  %71 = vst.msk [vmem:[#allocation0 + $0x42] ss:$8 sm:$0xf0] %vm21_vm0, %v66_v12  }
  0x82   :  { %52 = vst.msk [vmem:[#allocation0 + $0x41] ss:$8 sm:$0xf] %vm21_vm0, %v49_v13   ;;  %54 = vst.msk [vmem:[#allocation0 + $0x41] ss:$8 sm:$0xf0] %vm21_vm0, %v49_v13  }
  0x84   :  { %v83_v14 = vpop.permute.xlu1 %82   ;;  %v74_v15 = vpop.permute.xlu0 %73  }
  0x85   :  { %86 = vst.msk [vmem:[#allocation0 + $0x43] ss:$8 sm:$0xf] %vm21_vm0, %v83_v14   ;;  %88 = vst.msk [vmem:[#allocation0 + $0x43] ss:$8 sm:$0xf0] %vm21_vm0, %v83_v14  }
  0x86   :  { %77 = vst.msk [vmem:[#allocation0 + $0x3] ss:$8 sm:$0xf] %vm21_vm0, %v74_v15   ;;  %79 = vst.msk [vmem:[#allocation0 + $0x3] ss:$8 sm:$0xf0] %vm21_vm0, %v74_v15  }
  0x8c   :  { %v137_v16 = vld [vmem:[#allocation0 + $0x40] sm:$0xf]  ;;  %v143_v17 = vld [vmem:[#allocation0 + $0x48] sm:$0xf]  ;;  %v149_v18 = vld [vmem:[#allocation0 + $0x50] sm:$0xf] }
  0x8d   :  { %210 = vst [vmem:[%s311_s1 + $0x20] sm:$0xf] %v137_v16  ;;  %211 = vst [vmem:[%s311_s1 + $0x24] sm:$0xf] %v143_v17  ;;  %v155_v19 = vld [vmem:[#allocation0 + $0x58] sm:$0xf] }
  0x8e   :  { %212 = vst [vmem:[%s311_s1 + $0x28] sm:$0xf] %v149_v18  ;;  %v161_v20 = vld [vmem:[#allocation0 + $0x60] sm:$0xf]  ;;  %v167_v21 = vld [vmem:[#allocation0 + $0x68] sm:$0xf] }
  0x8f   :  { %213 = vst [vmem:[%s311_s1 + $0x2c] sm:$0xf] %v155_v19  ;;  %214 = vst [vmem:[%s311_s1 + $0x30] sm:$0xf] %v161_v20  ;;  %v173_v22 = vld [vmem:[#allocation0 + $0x70] sm:$0xf] }
  0x90   :  { %215 = vst [vmem:[%s311_s1 + $0x34] sm:$0xf] %v167_v21  ;;  %v179_v23 = vld [vmem:[#allocation0 + $0x78] sm:$0xf]  ;;  %v92_v24 = vld [vmem:[#allocation0] sm:$0xf] }
  0x91   :  { %216 = vst [vmem:[%s311_s1 + $0x38] sm:$0xf] %v173_v22  ;;  %217 = vst [vmem:[%s311_s1 + $0x3c] sm:$0xf] %v179_v23  ;;  %v96_v25 = vld [vmem:[#allocation0 + $0x8] sm:$0xf] }
  0x92   :  { %94 = vst [vmem:[%s311_s1] sm:$0xf] %v92_v24  ;;  %v101_v26 = vld [vmem:[#allocation0 + $0x10] sm:$0xf]  ;;  %v107_v27 = vld [vmem:[#allocation0 + $0x18] sm:$0xf] }
  0x93   :  { %203 = vst [vmem:[%s311_s1 + $0x4] sm:$0xf] %v96_v25  ;;  %204 = vst [vmem:[%s311_s1 + $0x8] sm:$0xf] %v101_v26  ;;  %v113_v28 = vld [vmem:[#allocation0 + $0x20] sm:$0xf] }
  0x94   :  { %205 = vst [vmem:[%s311_s1 + $0xc] sm:$0xf] %v107_v27  ;;  %v119_v29 = vld [vmem:[#allocation0 + $0x28] sm:$0xf]  ;;  %v125_v30 = vld [vmem:[#allocation0 + $0x30] sm:$0xf] }
  0x95   :  { %206 = vst [vmem:[%s311_s1 + $0x10] sm:$0xf] %v113_v28  ;;  %207 = vst [vmem:[%s311_s1 + $0x14] sm:$0xf] %v119_v29  ;;  %v131_v31 = vld [vmem:[#allocation0 + $0x38] sm:$0xf] }
  0x96   :  { %208 = vst [vmem:[%s311_s1 + $0x18] sm:$0xf] %v125_v30  ;;  %209 = vst [vmem:[%s311_s1 + $0x1c] sm:$0xf] %v131_v31 }

// kernel: reverse.0
= control target key start
LH: loop header
LB: loop body
LE: loop exit
PB: predicated region body
PF: predicated region fallthrough
CT: control target
= control target key end

     0   :  { %v71_v3 = vlaneseq  ;;  %v64_v9 = vld [vmem:[#allocation0 + $0x7] ss:$-1 sm:$0xff]  ;;  %v78_v12 = vld [vmem:[#allocation0 + $0x17] ss:$-1 sm:$0xff]  ;;  %s329_s0 = inlined_call_operand.vmem [shape: f32[2,4,16,7], index: 0, kind: input, shape index: {}]   ;;  %s330_s1 = inlined_call_operand.vmem [shape: f32[2,4,16,7], index: 1, kind: output, shape index: {}]  }
   0x1   :  { %v44_v0 = vld [vmem:[%s329_s0] sm:$0xff]  ;;  %v46_v1 = vld [vmem:[%s329_s0 + $0x8] sm:$0xff]  ;;  %v48_v2 = vld [vmem:[%s329_s0 + $0x10] sm:$0xff]  ;;  %v65_v10 = vrot.slane %v64_v9, 1  ;;  %v79_v14 = vrot.slane %v78_v12, 1 }
   0x2   :  { %45 = vst [vmem:[#allocation0 + $0x8] sm:$0xff] %v44_v0  ;;  %47 = vst [vmem:[#allocation0 + $0x18] sm:$0xff] %v46_v1  ;;  %v50_v4 = vld [vmem:[%s329_s0 + $0x18] sm:$0xff]  ;;  %v52_v5 = vld [vmem:[%s329_s0 + $0x20] sm:$0xff]  ;;  %v72_v11 = vshrl.u32 %v71_v3, 7 }
   0x3   :  { %49 = vst [vmem:[#allocation0 + $0x28] sm:$0xff] %v48_v2  ;;  %v54_v6 = vld [vmem:[%s329_s0 + $0x28] sm:$0xff]  ;;  %51 = vst [vmem:[#allocation0 + $0x38] sm:$0xff] %v50_v4  ;;  %v56_v7 = vld [vmem:[%s329_s0 + $0x30] sm:$0xff] }
   0x4   :  { %53 = vst [vmem:[#allocation0 + $0x48] sm:$0xff] %v52_v5  ;;  %55 = vst [vmem:[#allocation0 + $0x58] sm:$0xff] %v54_v6  ;;  %v58_v8 = vld [vmem:[%s329_s0 + $0x38] sm:$0xff]  ;;  %v92_v13 = vld [vmem:[#allocation0 + $0x27] ss:$-1 sm:$0xff]  ;;  %vm73_vm0 = vcmp.lt.s32.totalorder %v72_v11, 7 }
   0x5   :  { %57 = vst [vmem:[#allocation0 + $0x68] sm:$0xff] %v56_v7  ;;  %59 = vst [vmem:[#allocation0 + $0x78] sm:$0xff] %v58_v8  ;;  %v93_v15 = vrot.slane %v92_v13, 1  ;;  %v106_v16 = vld [vmem:[#allocation0 + $0x37] ss:$-1 sm:$0xff] }
   0x6   :  { %66 = vst [vmem:[#allocation1] sm:$0xff] %v65_v10  ;;  %v107_v17 = vrot.slane %v106_v16, 1  ;;  %v120_v18 = vld [vmem:[#allocation0 + $0x47] ss:$-1 sm:$0xff]  ;;  %v134_v19 = vld [vmem:[#allocation0 + $0x57] ss:$-1 sm:$0xff] }
   0x7   :  { %80 = vst [vmem:[#allocation1 + $0x8] sm:$0xff] %v79_v14  ;;  %94 = vst [vmem:[#allocation1 + $0x10] sm:$0xff] %v93_v15  ;;  %v121_v20 = vrot.slane %v120_v18, 1  ;;  %v135_v21 = vrot.slane %v134_v19, 1  ;;  %v148_v22 = vld [vmem:[#allocation0 + $0x67] ss:$-1 sm:$0xff] }
   0x8   :  { %v162_v23 = vld [vmem:[#allocation0 + $0x77] ss:$-1 sm:$0xff]  ;;  %108 = vst [vmem:[#allocation1 + $0x18] sm:$0xff] %v107_v17  ;;  %v149_v24 = vrot.slane %v148_v22, 1 }
   0x9   :  { %v163_v25 = vrot.slane %v162_v23, 1  ;;  %v69_v26 = vld [vmem:[#allocation0 + $0xf] ss:$-1 sm:$0xff]  ;;  %v83_v27 = vld [vmem:[#allocation0 + $0x1f] ss:$-1 sm:$0xff]  ;;  %122 = vst [vmem:[#allocation1 + $0x20] sm:$0xff] %v121_v20 }
   0xa   :  { %v97_v28 = vld [vmem:[#allocation0 + $0x2f] ss:$-1 sm:$0xff]  ;;  %136 = vst [vmem:[#allocation1 + $0x28] sm:$0xff] %v135_v21  ;;  %v70_v29 = vrot.slane %v69_v26, 1  ;;  %v84_v30 = vrot.slane %v83_v27, 1  ;;  %150 = vst [vmem:[#allocation1 + $0x30] sm:$0xff] %v149_v24 }
   0xb   :  { %v98_v31 = vrot.slane %v97_v28, 1  ;;  %v111_v32 = vld [vmem:[#allocation0 + $0x3f] ss:$-1 sm:$0xff]  ;;  %164 = vst [vmem:[#allocation1 + $0x38] sm:$0xff] %v163_v25  ;;  %v125_v34 = vld [vmem:[#allocation0 + $0x4f] ss:$-1 sm:$0xff] }
   0xc   :  { %v112_v33 = vrot.slane %v111_v32, 1  ;;  %v139_v35 = vld [vmem:[#allocation0 + $0x5f] ss:$-1 sm:$0xff]  ;;  %74 = vst.msk [vmem:[#allocation1] sm:$0xff] %vm73_vm0, %v70_v29  ;;  %88 = vst.msk [vmem:[#allocation1 + $0x8] sm:$0xff] %vm73_vm0, %v84_v30  ;;  %v126_v36 = vrot.slane %v125_v34, 1 }
   0xd   :  { %102 = vst.msk [vmem:[#allocation1 + $0x10] sm:$0xff] %vm73_vm0, %v98_v31  ;;  %v140_v37 = vrot.slane %v139_v35, 1  ;;  %v153_v38 = vld [vmem:[#allocation0 + $0x6f] ss:$-1 sm:$0xff]  ;;  %v167_v39 = vld [vmem:[#allocation0 + $0x7f] ss:$-1 sm:$0xff] }
   0xe   :  { %116 = vst.msk [vmem:[#allocation1 + $0x18] sm:$0xff] %vm73_vm0, %v112_v33  ;;  %v154_v40 = vrot.slane %v153_v38, 1  ;;  %v168_v41 = vrot.slane %v167_v39, 1  ;;  %130 = vst.msk [vmem:[#allocation1 + $0x20] sm:$0xff] %vm73_vm0, %v126_v36 }
   0xf   :  { %144 = vst.msk [vmem:[#allocation1 + $0x28] sm:$0xff] %vm73_vm0, %v140_v37 }
  0x10   :  { %158 = vst.msk [vmem:[#allocation1 + $0x30] sm:$0xff] %vm73_vm0, %v154_v40  ;;  %172 = vst.msk [vmem:[#allocation1 + $0x38] sm:$0xff] %vm73_vm0, %v168_v41 }
  0x13   :  { %v214_v42 = vld [vmem:[#allocation1] sm:$0xff]  ;;  %v216_v43 = vld [vmem:[#allocation1 + $0x8] sm:$0xff] }
  0x14   :  { %v218_v44 = vld [vmem:[#allocation1 + $0x10] sm:$0xff]  ;;  %215 = vst [vmem:[%s330_s1] sm:$0xff] %v214_v42  ;;  %217 = vst [vmem:[%s330_s1 + $0x8] sm:$0xff] %v216_v43 }
  0x15   :  { %219 = vst [vmem:[%s330_s1 + $0x10] sm:$0xff] %v218_v44  ;;  %v220_v45 = vld [vmem:[#allocation1 + $0x18] sm:$0xff]  ;;  %v222_v46 = vld [vmem:[#allocation1 + $0x20] sm:$0xff] }
  0x16   :  { %221 = vst [vmem:[%s330_s1 + $0x18] sm:$0xff] %v220_v45  ;;  %v224_v47 = vld [vmem:[#allocation1 + $0x28] sm:$0xff]  ;;  %223 = vst [vmem:[%s330_s1 + $0x20] sm:$0xff] %v222_v46 }
  0x17   :  { %225 = vst [vmem:[%s330_s1 + $0x28] sm:$0xff] %v224_v47  ;;  %v226_v48 = vld [vmem:[#allocation1 + $0x30] sm:$0xff]  ;;  %v228_v49 = vld [vmem:[#allocation1 + $0x38] sm:$0xff] }
  0x18   :  { %227 = vst [vmem:[%s330_s1 + $0x30] sm:$0xff] %v226_v48  ;;  %229 = vst [vmem:[%s330_s1 + $0x38] sm:$0xff] %v228_v49 }

// kernel: _lambda_.1
= control target key start
LH: loop header
LB: loop body
LE: loop exit
PB: predicated region body
PF: predicated region fallthrough
CT: control target
= control target key end

     0   :  { %s934_s12 = smov 0   ;;  %s936_s13 = smov 0   ;;  %s1178_s0 = inlined_call_operand.vmem [shape: f32[2,2,4,2,128], index: 0, kind: input, shape index: {}]   ;;  %s1179_s1 = inlined_call_operand.vmem [shape: f32[2,2,2,128], index: 1, kind: input, shape index: {}]   ;;  %s1180_s2 = inlined_call_operand.vmem [shape: s8[2,2,4,4,128], index: 2, kind: input, shape index: {}]   ;;  %s1181_s3 = inlined_call_operand.vmem [shape: f32[2,2,2,4,128], index: 3, kind: output, shape index: {}]  }
   0x1   :  { %s938_s14 = smov 0  }
   0x2 LB: > { %s25_s15 = sadd.s32 1, %s907_s13  ;;  %p824_p0 = scmp.ge.s32.totalorder %s911_s14, 1  ;;  %s911_s14 = sphi %s938_s14, %s13_s14   ;;  %s907_s13 = sphi %s936_s13, %s1183_s13   ;;  %s903_s12 = sphi %s934_s12, %s1182_s12  }
   0x3   : > { %p27_p1 = scmp.ge.s32.totalorder %s25_s15, 2  ;;  %p175_p2 = scmp.lt.s32.totalorder %s911_s14, 3 }
   0x5   : > { %s1185_s15 = smov (%p27_p1, %s25_s15), 0  ;;  %p176_p3 = pnand %p824_p0, %p175_p2 }
   0x6   : > { %p214_p4 = scmp.lt.s32.totalorder (!%p176_p3), %s903_s12, 1  ;;  %v264_v0 = vlaneseq (!%p176_p3)  ;;  %p239_p5 = scmp.eq.s32.totalorder (!%p176_p3), %s903_s12, 0  ;;  %v913_v1 = vmov (!%p176_p3), 1966171168  }
   0x7   : > { %179 = sbr.rel (%p176_p3) target bundleno = 66 (0x42), region = 32  ;;  %v262_v2 = vunpack.c.l.s4 (!%p176_p3), %v913_v1 }
   0x8   : > { %v265_v3 = vshrl.u32 (!%p176_p3), %v264_v0, 7 }
   0x9   : > { %v263_v4 = vunpack.c.0.s8 (!%p176_p3), %v262_v2 }
   0xa   : > { %v971_v6 = vsub.s32 (!%p176_p3), 0, %v265_v3 }
   0xb   : > { %v969_v5 = vsub.s32 (!%p176_p3), %v263_v4, %v265_v3 }
   0xe   : > { %s957_s16 = scalar_select %p214_p4, %s903_s12, 1 }
   0xf   : > { %s240_s17 = scalar_select %p239_p5, 0.00024345276, 0.00024359755 }
  0x10   : > { %s861_s18 = sshll.u32 %s957_s16, 4  ;;  %s829_s22 = sshll.u32 %s957_s16, 3 }
  0x11   : > { %s967_s21 = scalar_lea.vmem %s1178_s0, %s861_s18  ;;  %s862_s23 = sshll.u32 %s957_s16, 2  ;;  %v990_v13 = vstv %s240_s17 }
  0x12   : > { %v834_v7 = vld.sshfl [vmem:[%s967_s21] sm:$0x11 pattern:$0x75316420]  ;;  %s979_s26 = scalar_lea.vmem %s1180_s2, %s829_s22  ;;  %s223_s30 = scalar_lea.vmem %s1179_s1, %s862_s23 }
  0x13   : > { %v982_v8 = vld.sshfl [vmem:[%s967_s21 + $0x8] sm:$0x11 pattern:$0x75316420]  ;;  %v260_v9 = vcombine.high %v834_v7, %v834_v7  ;;  %v267_v10 = vrot.slane %v834_v7, %v969_v5  ;;  %v245_v11 = vld [vmem:[%s979_s26] sm:$0x1]  ;;  %s1124_s6 = scalar_lea.vmem %s1181_s3, %s861_s18 }
  0x14   : > { %s241_s27 = scalar_select %p239_p5, 0.030983513, 0.030996159  ;;  %v304_v12 = vrot.slane %v982_v8, %v969_v5  ;;  %v246_v14 = vunpack.c.0.s8 %v245_v11  ;;  %v833_v15 = vld [vmem:[%s979_s26 + $0x4] sm:$0x1]  ;;  %v297_v17 = vcombine.high %v982_v8, %v982_v8 }
  0x15   : > { %v994_v16 = vrot.slane %v267_v10, %v971_v6  ;;  %v840_v18 = vld.sshfl [vmem:[%s967_s21 + $0x2] sm:$0x11 pattern:$0x75316420]  ;;  %v274_v19 = vrot.slane %v260_v9, %v969_v5  ;;  %v250_v20 = vunpack.c.0.s8 %v833_v15  ;;  %v838_v23 = vld [vmem:[%s979_s26 + $0x1] sm:$0x1] }
  0x16   : > { %v1001_v21 = vrot.slane %v304_v12, %v971_v6  ;;  %v1004_v22 = vld.sshfl [vmem:[%s967_s21 + $0xa] sm:$0x11 pattern:$0x75316420]  ;;  %v354_v24 = vcombine.high %v840_v18, %v840_v18  ;;  %v361_v25 = vrot.slane %v840_v18, %v969_v5  ;;  %v1008_v26 = vcvt.s32.f32 %v246_v14  ;;  %v839_v28 = vld [vmem:[%s979_s26 + $0x5] sm:$0x1] }
  0x17   : > { %v340_v27 = vunpack.c.0.s8 %v838_v23  ;;  %v398_v29 = vrot.slane %v1004_v22, %v969_v5  ;;  %v1014_v30 = vld.sshfl [vmem:[%s967_s21 + $0x4] sm:$0x11 pattern:$0x75316420]  ;;  %v1016_v31 = vstv %s241_s27  ;;  %v1018_v32 = vcvt.s32.f32 %v250_v20  ;;  %v844_v35 = vld [vmem:[%s979_s26 + $0x2] sm:$0x1] }
  0x18   : > { %v344_v33 = vunpack.c.0.s8 %v839_v28  ;;  %v1021_v34 = vrot.slane %v361_v25, %v971_v6  ;;  %v455_v36 = vrot.slane %v1014_v30, %v969_v5  ;;  %v285_v37 = vmul.f32 %v994_v16, %v1008_v26  ;;  %v845_v41 = vld [vmem:[%s979_s26 + $0x6] sm:$0x1]  ;;  %v847_v44 = vld.sshfl [vmem:[%s967_s21 + $0xc] sm:$0x11 pattern:$0x75316420] }
  0x19   : > { %v1028_v38 = vcvt.s32.f32 %v340_v27  ;;  %v1031_v39 = vrot.slane %v398_v29, %v971_v6  ;;  %v434_v40 = vunpack.c.0.s8 %v844_v35  ;;  %v322_v42 = vmul.f32 %v1001_v21, %v1018_v32  ;;  %v850_v47 = vld [vmem:[%s979_s26 + $0x3] sm:$0x1]  ;;  %v852_v51 = vld.sshfl [vmem:[%s967_s21 + $0x6] sm:$0x11 pattern:$0x75316420] }
  0x1a   : > { %v1041_v43 = vcvt.s32.f32 %v344_v33  ;;  %v438_v45 = vunpack.c.0.s8 %v845_v41  ;;  %v1045_v46 = vrot.slane %v455_v36, %v971_v6  ;;  %v492_v50 = vrot.slane %v847_v44, %v969_v5  ;;  %v851_v53 = vld [vmem:[%s979_s26 + $0x7] sm:$0x1]  ;;  %v853_v57 = vld.sshfl [vmem:[%s967_s21 + $0xe] sm:$0x11 pattern:$0x75316420] }
  0x1b   : > { %v379_v48 = vmul.f32 %v1021_v34, %v1028_v38  ;;  %v1050_v49 = vcvt.s32.f32 %v434_v40  ;;  %v528_v52 = vunpack.c.0.s8 %v850_v47  ;;  %v324_v54 = vsub.f32 %v285_v37, %v322_v42  ;;  %v854_v63 = vld.sshfl [vmem:[%s223_s30] sm:$0x11 pattern:$0x75316420] }
  0x1c   : > { %v416_v55 = vmul.f32 %v1031_v39, %v1041_v43  ;;  %v1057_v56 = vcvt.s32.f32 %v438_v45  ;;  %v532_v58 = vunpack.c.0.s8 %v851_v53  ;;  %v1063_v60 = vrot.slane %v492_v50, %v971_v6  ;;  %v856_v4 = vld.sshfl [vmem:[%s223_s30 + $0x2] sm:$0x11 pattern:$0x75316420] }
  0x1d   : > { %v473_v59 = vmul.f32 %v1045_v46, %v1050_v49  ;;  %v1065_v61 = vcvt.s32.f32 %v528_v52  ;;  %v549_v62 = vrot.slane %v852_v51, %v969_v5  ;;  %v381_v0 = vadd.f32 %v379_v48, %v324_v54 }
  0x1e   : > { %v1068_v1 = vcvt.s32.f32 %v532_v58  ;;  %v586_v2 = vrot.slane %v853_v57, %v969_v5  ;;  %v1072_v3 = vrot.slane %v854_v63, %v969_v5  ;;  %v510_v7 = vmul.f32 %v1063_v60, %v1057_v56 }
  0x1f   : > { %v1077_v8 = vrot.slane %v549_v62, %v971_v6  ;;  %v1080_v9 = vrot.slane %v856_v4, %v969_v5  ;;  %v282_v10 = vrot.slane %v274_v19, %v971_v6  ;;  %v418_v11 = vsub.f32 %v381_v0, %v416_v55 }
  0x20   : > { %v1084_v12 = vrot.slane %v586_v2, %v971_v6  ;;  %v311_v14 = vrot.slane %v297_v17, %v969_v5  ;;  %v368_v15 = vrot.slane %v354_v24, %v969_v5  ;;  %v391_v25 = vcombine.high %v1004_v22, %v1004_v22 }
  0x21   : > { %v567_v18 = vmul.f32 %v1077_v8, %v1065_v61  ;;  %v672_v20 = vsub.f32 %v1072_v3, %v1080_v9  ;;  %v286_v23 = vmul.f32 %v282_v10, %v1008_v26  ;;  %v475_v19 = vadd.f32 %v473_v59, %v418_v11 }
  0x22   : > { %v604_v27 = vmul.f32 %v1084_v12, %v1068_v1  ;;  %v319_v28 = vrot.slane %v311_v14, %v971_v6  ;;  %v376_v17 = vrot.slane %v368_v15, %v971_v6  ;;  %v405_v29 = vrot.slane %v391_v25, %v969_v5 }
  0x23   : > { %v675_v24 = vmul.f32 %v1016_v31, %v672_v20  ;;  %v448_v33 = vcombine.high %v1014_v30, %v1014_v30  ;;  %v485_v35 = vcombine.high %v847_v44, %v847_v44  ;;  %v512_v36 = vsub.f32 %v475_v19, %v510_v7 }
  0x24   : > { %v323_v37 = vmul.f32 %v319_v28, %v1018_v32  ;;  %v380_v22 = vmul.f32 %v376_v17, %v1028_v38  ;;  %v542_v40 = vcombine.high %v852_v51, %v852_v51  ;;  %v413_v42 = vrot.slane %v405_v29, %v971_v6 }
  0x25   : > { %v682_v41 = vrot.slane %v675_v24, %v971_v6  ;;  %v462_v45 = vrot.slane %v448_v33, %v969_v5  ;;  %v499_v47 = vrot.slane %v485_v35, %v969_v5  ;;  %v569_v48 = vadd.f32 %v567_v18, %v512_v36 }
  0x26   : > { %v325_v50 = vsub.f32 %v286_v23, %v323_v37  ;;  %v556_v52 = vrot.slane %v542_v40, %v969_v5  ;;  %v579_v30 = vcombine.high %v853_v57, %v853_v57  ;;  %v417_v44 = vmul.f32 %v413_v42, %v1041_v43 }
  0x27   : > { %v470_v53 = vrot.slane %v462_v45, %v971_v6  ;;  %v507_v51 = vrot.slane %v499_v47, %v971_v6  ;;  %v625_v54 = vcombine.high %v854_v63, %v854_v63  ;;  %v606_v55 = vsub.f32 %v569_v48, %v604_v27 }
  0x28   : > { %v382_v58 = vadd.f32 %v380_v22, %v325_v50  ;;  %v564_v59 = vrot.slane %v556_v52, %v971_v6  ;;  %v593_v62 = vrot.slane %v579_v30, %v969_v5  ;;  %v652_v7 = vcombine.high %v856_v4, %v856_v4 }
  0x29   : > { %v474_v0 = vmul.f32 %v470_v53, %v1050_v49  ;;  %v639_v2 = vrot.slane %v625_v54, %v969_v5  ;;  %v670_v57 = vmul.f32 %v990_v13, %v606_v55  ;;  %v511_v14 = vmul.f32 %v507_v51, %v1057_v56 }
  0x2a   : > { %v419_v11 = vsub.f32 %v382_v58, %v417_v44  ;;  %v666_v63 = vrot.slane %v652_v7, %v969_v5  ;;  %v326_v15 = vmul.f32 %v1001_v21, %v1008_v26  ;;  %v330_v4 = vmul.f32 %v994_v16, %v1018_v32 }
  0x2b   : > { %v420_v18 = vmul.f32 %v1031_v39, %v1028_v38  ;;  %v689_v20 = vadd.f32 %v682_v41, %v670_v57  ;;  %v568_v25 = vmul.f32 %v564_v59, %v1065_v61  ;;  %v601_v19 = vrot.slane %v593_v62, %v971_v6 }
  0x2c   : > { %v476_v23 = vadd.f32 %v474_v0, %v419_v11  ;;  %v673_v27 = vsub.f32 %v639_v2, %v666_v63  ;;  %v332_v24 = vadd.f32 %v330_v4, %v326_v15  ;;  %v424_v5 = vmul.f32 %v1021_v34, %v1041_v43 }
  0x2d   : > { %691 = vst [vmem:[%s1124_s6] sm:$0xf] %v689_v20  ;;  %v605_v21 = vmul.f32 %v601_v19, %v1068_v1  ;;  %v514_v16 = vmul.f32 %v1063_v60, %v1050_v49  ;;  %v327_v35 = vmul.f32 %v319_v28, %v1008_v26  ;;  %v331_v36 = vmul.f32 %v282_v10, %v1018_v32 }
  0x2e   : > { %v513_v29 = vsub.f32 %v476_v23, %v511_v14  ;;  %v676_v39 = vmul.f32 %v1016_v31, %v673_v27  ;;  %v422_v33 = vadd.f32 %v420_v18, %v332_v24  ;;  %v695_v22 = vadd.f32 %v1080_v9, %v1072_v3 }
  0x2f   : > { %v421_v34 = vmul.f32 %v413_v42, %v1028_v38  ;;  %v518_v41 = vmul.f32 %v1045_v46, %v1057_v56  ;;  %v333_v45 = vadd.f32 %v331_v36, %v327_v35  ;;  %v425_v60 = vmul.f32 %v376_v17, %v1041_v43 }
  0x30   : > { %v570_v37 = vadd.f32 %v568_v25, %v513_v29  ;;  %v426_v40 = vadd.f32 %v424_v5, %v422_v33  ;;  %v686_v48 = vrot.slane %v676_v39, %v971_v6  ;;  %v608_v32 = vmul.f32 %v1084_v12, %v1065_v61 }
  0x31   : > { %v423_v10 = vadd.f32 %v421_v34, %v333_v45  ;;  %v515_v3 = vmul.f32 %v507_v51, %v1050_v49  ;;  %v612_v9 = vmul.f32 %v1077_v8, %v1068_v1  ;;  %v697_v46 = vmul.f32 %v695_v22, %v1016_v31 }
  0x32   : > { %v607_v47 = vsub.f32 %v570_v37, %v605_v21  ;;  %v516_v26 = vadd.f32 %v514_v16, %v426_v40  ;;  %v519_v17 = vmul.f32 %v470_v53, %v1057_v56  ;;  %v696_v42 = vadd.f32 %v666_v63, %v639_v2 }
  0x33   : > { %v427_v43 = vadd.f32 %v425_v60, %v423_v10  ;;  %v609_v12 = vmul.f32 %v601_v19, %v1065_v61  ;;  %v704_v49 = vrot.slane %v697_v46, %v971_v6  ;;  %v613_v8 = vmul.f32 %v564_v59, %v1068_v1 }
  0x34   : > { %v671_v38 = vmul.f32 %v990_v13, %v607_v47  ;;  %v520_v28 = vadd.f32 %v518_v41, %v516_v26  ;;  %v698_v54 = vmul.f32 %v696_v42, %v1016_v31 }
  0x35   : > { %v517_v30 = vadd.f32 %v515_v3, %v427_v43 }
  0x36   : > { %v690_v50 = vadd.f32 %v686_v48, %v671_v38  ;;  %v610_v52 = vadd.f32 %v608_v32, %v520_v28  ;;  %v708_v62 = vrot.slane %v698_v54, %v971_v6 }
  0x37   : > { %v521_v51 = vadd.f32 %v519_v17, %v517_v30 }
  0x38   : > { %692 = vst [vmem:[%s1124_s6 + $0x4] sm:$0xf] %v690_v50  ;;  %v614_v44 = vadd.f32 %v612_v9, %v610_v52 }
  0x39   : > { %v611_v56 = vadd.f32 %v609_v12, %v521_v51 }
  0x3a   : > { %v693_v55 = vmul.f32 %v990_v13, %v614_v44 }
  0x3b   : > { %v615_v58 = vadd.f32 %v613_v8, %v611_v56 }
  0x3c   : > { %v711_v53 = vadd.f32 %v704_v49, %v693_v55 }
  0x3d   : > { %v694_v0 = vmul.f32 %v990_v13, %v615_v58 }
  0x3e   : > { %857 = vst [vmem:[%s1124_s6 + $0x8] sm:$0xf] %v711_v53 }
  0x3f   : > { %v712_v61 = vadd.f32 %v708_v62, %v694_v0 }
  0x41   : > { %858 = vst [vmem:[%s1124_s6 + $0xc] sm:$0xf] %v712_v61 }
  0x42 PF: > { %s13_s14 = sadd.s32 1, %s911_s14   ;;  %s1182_s12 = smov %s907_s13 }
  0x43   : > { %p10_p6 = scmp.ge.s32.totalorder %s13_s14, 4   ;;  %s1183_s13 = smov %s1185_s15 }
  0x45   :  { %12 = sbr.rel (!%p10_p6) target bundleno = 2 (0x2), region = 84 }

</bundles_post_ra>
